<compile_context>
chip_gen: v7x
topology: tpu7x:2x2x1
jax: 0.10.0
libtpu: 0.0.40
codegen_flags: <defaults>
</compile_context>

<pallas_src>
import jax
import jax.numpy as jnp
from jax.experimental import pallas as pl
from jax.experimental.pallas import tpu as pltpu


def _round_up(x, m):
    return ((x + m - 1) // m) * m


# --------------------------------------------------------------------------- #
# Kernels
# --------------------------------------------------------------------------- #

def _fc_kernel_single_k(x_ref, w_ref, o_ref):
    """o = relu(x @ w) with the full contraction dim resident (no accumulator)."""
    y = jnp.dot(x_ref[...], w_ref[...], preferred_element_type=jnp.float32)
    o_ref[...] = jnp.maximum(y, 0.0).astype(o_ref.dtype)


def _fc_kernel_multi_k(x_ref, w_ref, o_ref, acc_ref):
    """K-tiled o = relu(x @ w) with f32 VMEM accumulator (init / finalize)."""
    ki = pl.program_id(2)

    @pl.when(ki == 0)
    def _():
        acc_ref[...] = jnp.zeros_like(acc_ref)

    acc_ref[...] += jnp.dot(x_ref[...], w_ref[...],
                            preferred_element_type=jnp.float32)

    @pl.when(ki == pl.num_programs(2) - 1)
    def _():
        o_ref[...] = jnp.maximum(acc_ref[...], 0.0).astype(o_ref.dtype)


# --------------------------------------------------------------------------- #
# Tile selection / VMEM budgeting helpers
# --------------------------------------------------------------------------- #

def _vmem_capacity_bytes():
    try:
        return int(pltpu.get_tpu_info().vmem_capacity_bytes)
    except Exception:
        return 64 << 20  # conservative default (v7x per-TC VMEM)


def _pick_aligned_tile(full, cap, align):
    """Largest multiple of `align` dividing `full` (itself a multiple of `align`)
    that is <= cap; returns `full` if it already fits."""
    if full <= cap:
        return full
    t = max(align, (cap // align) * align)
    while t > align and full % t:
        t -= align
    return max(t, align)


def _pick_k_tile(in_dim, cap):
    """K tile: full in_dim if it fits, else a lane-aligned (x128) divisor."""
    if in_dim <= cap:
        return in_dim
    t = max(128, (cap // 128) * 128)
    while t >= 128:
        if in_dim % t == 0:
            return t
        t -= 128
    return in_dim  # no lane-aligned divisor -> keep full K resident


def _vmem_need(tm, tn, tk, k_tiles, c_item, o_item):
    need = 2 * tm * tk * c_item        # x tile   (double-buffered)
    need += 2 * tk * tn * c_item       # w tile   (double-buffered)
    need += 2 * tm * tn * o_item       # out tile (double-buffered)
    if k_tiles > 1:
        need += tm * tn * 4            # f32 accumulator scratch
    return need


# --------------------------------------------------------------------------- #
# Single linear+relu dispatch (one side: lnc or dis)
# --------------------------------------------------------------------------- #

def _linear_relu(x, w_t, *, out_dim, out_dtype, tm, tn_cap, tk_cap):
    """relu(x @ w_t)[:, :out_dim], with w_t already [in_dim, out_pad] (out_pad % 128 == 0)."""
    n_rows, in_dim = x.shape
    in_dim_w, out_pad = w_t.shape
    assert in_dim == in_dim_w, "weight / activation input_dim mismatch"

    c_item = jnp.dtype(x.dtype).itemsize
    o_item = jnp.dtype(out_dtype).itemsize
    row_align = 8 if c_item >= 4 else (16 if c_item == 2 else 32)

    # Row tile: if all rows fit in one tile, use the exact row count (block ==
    # full dim is always legal); otherwise a sublane-aligned tile with a masked
    # partial edge block.
    if n_rows <= tm:
        tm = n_rows
    else:
        tm = max(row_align, _round_up(tm, row_align))
    tn = _pick_aligned_tile(out_pad, tn_cap, 128)
    tk = _pick_k_tile(in_dim, tk_cap)

    # Generation-aware VMEM budget; shrink tiles (tm -> tn -> tk) until we fit.
    cap = _vmem_capacity_bytes()
    budget = int(0.7 * cap)
    for _ in range(32):
        k_tiles = in_dim // tk
        if _vmem_need(tm, tn, tk, k_tiles, c_item, o_item) <= budget:
            break
        if tm > row_align:
            tm = max(row_align, _round_up(tm // 2, row_align))
        elif tn > 128:
            tn = _pick_aligned_tile(out_pad, tn // 2, 128)
        else:
            new_tk = _pick_k_tile(in_dim, max(128, tk // 2))
            if new_tk >= tk:
                break
            tk = new_tk

    k_tiles = in_dim // tk
    m_tiles = pl.cdiv(n_rows, tm)
    n_tiles = out_pad // tn

    need = _vmem_need(tm, tn, tk, k_tiles, c_item, o_item)
    vmem_limit = int(min(max(int(1.5 * need) + (2 << 20), 4 << 20),
                         int(0.9 * cap)))

    if k_tiles == 1:
        kernel = _fc_kernel_single_k
        grid = (m_tiles, n_tiles)
        in_specs = [
            pl.BlockSpec((tm, tk), lambda mi, ni: (mi, 0)),
            pl.BlockSpec((tk, tn), lambda mi, ni: (0, ni)),
        ]
        out_specs = pl.BlockSpec((tm, tn), lambda mi, ni: (mi, ni))
        scratch_shapes = []
        dim_sem = ("parallel", "parallel")
    else:
        kernel = _fc_kernel_multi_k
        grid = (m_tiles, n_tiles, k_tiles)
        in_specs = [
            pl.BlockSpec((tm, tk), lambda mi, ni, ki: (mi, ki)),
            pl.BlockSpec((tk, tn), lambda mi, ni, ki: (ki, ni)),
        ]
        out_specs = pl.BlockSpec((tm, tn), lambda mi, ni, ki: (mi, ni))
        scratch_shapes = [pltpu.VMEM((tm, tn), jnp.float32)]
        dim_sem = ("parallel", "parallel", "arbitrary")

    out = pl.pallas_call(
        kernel,
        out_shape=jax.ShapeDtypeStruct((n_rows, out_pad), out_dtype),
        grid_spec=pltpu.PrefetchScalarGridSpec(
            num_scalar_prefetch=0,
            grid=grid,
            in_specs=in_specs,
            out_specs=out_specs,
            scratch_shapes=scratch_shapes,
        ),
        compiler_params=pltpu.CompilerParams(
            dimension_semantics=dim_sem,
            vmem_limit_bytes=vmem_limit,
        ),
    )(x, w_t)

    return out if out_pad == out_dim else out[:, :out_dim]


# --------------------------------------------------------------------------- #
# FullyConnected forward (eval mode)
# --------------------------------------------------------------------------- #

def fully_connected(lnc_inputs, dis_inputs, w_lnc, w_dis=None, *,
                    tm=512, tn_cap=1024, tk_cap=2048, compute_dtype=None):
    """Pallas forward of FullyConnected (eval mode: dropout identity, no bias).

    Args:
      lnc_inputs: [n_lnc, input_dim]
      dis_inputs: [n_dis, input_dim]
      w_lnc, w_dis: PyTorch nn.Linear layout [output_dim, input_dim].
        w_dis=None (or w_dis is w_lnc) means share_weights=True.
      tm / tn_cap / tk_cap: tile-size caps (row / output / reduction).
      compute_dtype: optional dtype (e.g. jnp.bfloat16) for activations+weights;
        accumulation stays f32, output keeps the input dtype.
    Returns:
      (lnc_outputs [n_lnc, output_dim], dis_outputs [n_dis, output_dim])
    """
    out_dim, in_dim = w_lnc.shape
    assert lnc_inputs.shape[1] == in_dim and dis_inputs.shape[1] == in_dim

    cdt = compute_dtype if compute_dtype is not None else lnc_inputs.dtype
    out_pad = _round_up(out_dim, 128)

    def prep_weight(w):
        # One-time wrapper transpose + lane padding of the (small) weight:
        # [out_dim, in_dim] -> [in_dim, out_pad].
        wt = jnp.transpose(w).astype(cdt)
        if out_pad != out_dim:
            wt = jnp.pad(wt, ((0, 0), (0, out_pad - out_dim)))
        return wt

    wt_lnc = prep_weight(w_lnc)
    wt_dis = wt_lnc if (w_dis is None or w_dis is w_lnc) else prep_weight(w_dis)

    lnc_out = _linear_relu(lnc_inputs.astype(cdt), wt_lnc,
                           out_dim=out_dim, out_dtype=lnc_inputs.dtype,
                           tm=tm, tn_cap=tn_cap, tk_cap=tk_cap)
    dis_out = _linear_relu(dis_inputs.astype(cdt), wt_dis,
                           out_dim=out_dim, out_dtype=dis_inputs.dtype,
                           tm=tm, tn_cap=tn_cap, tk_cap=tk_cap)
    return lnc_out, dis_out


def _reference(lnc_inputs, dis_inputs, w_lnc, w_dis):
    lnc_o = jnp.maximum(lnc_inputs @ w_lnc.T, 0.0)
    dis_o = jnp.maximum(dis_inputs @ w_dis.T, 0.0)
    return lnc_o, dis_o


if __name__ == "__main__":
    # ---- small shapes consistent with the module's forward ---------------- #
    input_dim, output_dim = 32, 16
    n_lnc, n_dis = 8, 12

    key = jax.random.PRNGKey(0)
    k1, k2, k3, k4 = jax.random.split(key, 4)

    lnc_inputs = jax.random.normal(k1, (n_lnc, input_dim), dtype=jnp.float32)
    dis_inputs = jax.random.normal(k2, (n_dis, input_dim), dtype=jnp.float32)

    bound = 1.0 / jnp.sqrt(jnp.float32(input_dim))
    w_lnc = jax.random.uniform(k3, (output_dim, input_dim), minval=-bound,
                               maxval=bound, dtype=jnp.float32)
    w_dis = jax.random.uniform(k4, (output_dim, input_dim), minval=-bound,
                               maxval=bound, dtype=jnp.float32)

    ref_lnc, ref_dis = _reference(lnc_inputs, dis_inputs, w_lnc, w_dis)

    # 1) f32, separate weights (share_weights=False, module default).
    lnc_out, dis_out = fully_connected(lnc_inputs, dis_inputs, w_lnc, w_dis)
    jax.block_until_ready((lnc_out, dis_out))
    assert lnc_out.shape == (n_lnc, output_dim)
    assert dis_out.shape == (n_dis, output_dim)
    assert jnp.allclose(lnc_out, ref_lnc, atol=1e-5, rtol=1e-5)
    assert jnp.allclose(dis_out, ref_dis, atol=1e-5, rtol=1e-5)

    # 2) share_weights=True path (w_dis omitted -> reuse lnc weight).
    ref_lnc_s, ref_dis_s = _reference(lnc_inputs, dis_inputs, w_lnc, w_lnc)
    lnc_s, dis_s = fully_connected(lnc_inputs, dis_inputs, w_lnc)
    jax.block_until_ready((lnc_s, dis_s))
    assert jnp.allclose(lnc_s, ref_lnc_s, atol=1e-5, rtol=1e-5)
    assert jnp.allclose(dis_s, ref_dis_s, atol=1e-5, rtol=1e-5)

    # 3) bf16 compute path (f32 accumulation / f32 output); looser tolerance.
    lnc_b, dis_b = fully_connected(lnc_inputs, dis_inputs, w_lnc, w_dis,
                                   compute_dtype=jnp.bfloat16)
    jax.block_until_ready((lnc_b, dis_b))
    assert jnp.allclose(lnc_b, ref_lnc, atol=5e-2, rtol=5e-2)
    assert jnp.allclose(dis_b, ref_dis, atol=5e-2, rtol=5e-2)

    # 4) Exercise M (partial edge block) + N + K tiling with small tile caps.
    in2, out2 = 256, 160            # out_pad = 256 -> 2 N-tiles of 128
    n_lnc2, n_dis2 = 40, 72         # tm=16 -> partial last M block on both sides
    j1, j2, j3, j4 = jax.random.split(jax.random.PRNGKey(1), 4)
    x_lnc2 = jax.random.normal(j1, (n_lnc2, in2), dtype=jnp.float32)
    x_dis2 = jax.random.normal(j2, (n_dis2, in2), dtype=jnp.float32)
    b2 = 1.0 / jnp.sqrt(jnp.float32(in2))
    w_lnc2 = jax.random.uniform(j3, (out2, in2), minval=-b2, maxval=b2,
                                dtype=jnp.float32)
    w_dis2 = jax.random.uniform(j4, (out2, in2), minval=-b2, maxval=b2,
                                dtype=jnp.float32)
    ref_lnc2, ref_dis2 = _reference(x_lnc2, x_dis2, w_lnc2, w_dis2)
    lnc2, dis2 = fully_connected(x_lnc2, x_dis2, w_lnc2, w_dis2,
                                 tm=16, tn_cap=128, tk_cap=128)
    jax.block_until_ready((lnc2, dis2))
    assert lnc2.shape == (n_lnc2, out2) and dis2.shape == (n_dis2, out2)
    assert jnp.allclose(lnc2, ref_lnc2, atol=5e-3, rtol=5e-3)
    assert jnp.allclose(dis2, ref_dis2, atol=5e-3, rtol=5e-3)

    print("KERNEL_OK")
</pallas_src>

<mosaic_0001>
module attributes {stable_mosaic.version = 11 : i64} {
  func.func @_fc_kernel_single_k(%arg0: i32, %arg1: i32, %arg2: memref<8x32xf32, #tpu.memory_space<vmem>>, %arg3: memref<32x128xf32, #tpu.memory_space<vmem>>, %arg4: memref<8x128xf32, #tpu.memory_space<vmem>>) attributes {dimension_semantics = [#tpu.dimension_semantics<parallel>, #tpu.dimension_semantics<parallel>], iteration_bounds = array<i64: 1, 1>, scalar_prefetch = 0 : i64, scratch_operands = 0 : i64, tpu.core_type = #tpu.core_type<tc>, window_params = [{transform_indices = @transform_0, window_bounds = array<i64: 8, 32>}, {transform_indices = @transform_1, window_bounds = array<i64: 32, 128>}, {transform_indices = @transform_2, window_bounds = array<i64: 8, 128>}]} {
    %c0 = arith.constant 0 : index
    %c0_0 = arith.constant 0 : index
    %0 = vector.load %arg2[%c0, %c0_0] : memref<8x32xf32, #tpu.memory_space<vmem>>, vector<8x32xf32>
    %c0_1 = arith.constant 0 : index
    %c0_2 = arith.constant 0 : index
    %1 = vector.load %arg3[%c0_1, %c0_2] : memref<32x128xf32, #tpu.memory_space<vmem>>, vector<32x128xf32>
    %cst = arith.constant dense<0.000000e+00> : vector<8x128xf32>
    %2 = tpu.matmul %0, %1, %cst {dimension_numbers = #tpu.dot_dimension_numbers<[1], [0], [0], [1], [0, 0, 1, 1], [], []>} : vector<8x32xf32>, vector<32x128xf32>, vector<8x128xf32> -> vector<8x128xf32>
    %cst_3 = arith.constant 0.000000e+00 : f32
    %3 = vector.broadcast %cst_3 : f32 to vector<8x128xf32>
    %4 = arith.maximumf %2, %3 : vector<8x128xf32>
    %c0_4 = arith.constant 0 : index
    %c0_5 = arith.constant 0 : index
    %5 = vector.load %arg4[%c0_4, %c0_5] : memref<8x128xf32, #tpu.memory_space<vmem>>, vector<8x128xf32>
    tpu.vector_store %arg4[%c0_4, %c0_5], %4 {strides = array<i32>} : memref<8x128xf32, #tpu.memory_space<vmem>>, vector<8x128xf32>,
    return
  }
  func.func @transform_0(%arg0: i32, %arg1: i32) -> (i32, i32) {
    %c0_i32 = arith.constant 0 : i32
    %c0_i32_0 = arith.constant 0 : i32
    return %arg0, %c0_i32 : i32, i32
  }
  func.func @transform_1(%arg0: i32, %arg1: i32) -> (i32, i32) {
    %c0_i32 = arith.constant 0 : i32
    %c0_i32_0 = arith.constant 0 : i32
    return %c0_i32, %arg1 : i32, i32
  }
  func.func @transform_2(%arg0: i32, %arg1: i32) -> (i32, i32) {
    %c0_i32 = arith.constant 0 : i32
    return %arg0, %arg1 : i32, i32
  }
}

</mosaic_0001>

<bundles_post_ra>
// kernel: tpu_custom_call.1
= control target key start
LH: loop header
LB: loop body
LE: loop exit
PB: predicated region body
PF: predicated region fallthrough
CT: control target
= control target key end

     0   :  { %7 = vsyncpa [#allocation3], 0  ;;  %s304_s0 = inlined_call_operand.hbm [shape: f32[8,32], index: 0, kind: input, shape index: {}]   ;;  %s305_s1 = inlined_call_operand.hbm [shape: f32[32,128], index: 1, kind: input, shape index: {}]   ;;  %s306_s2 = inlined_call_operand.hbm [shape: f32[8,128], index: 2, kind: output, shape index: {}]  }
   0x1   :  { %8 = vsyncpa [#allocation6], 0 }
   0x2   :  { %9 = vsyncpa [#allocation4], 0  ;;  %s238_s9 = smov [#allocation2]   ;;  %s239_s11 = smov [#allocation5]  }
   0x3   :  { %s16_s10 = sshll.u32 %s238_s9, 4  ;;  %s25_s12 = sshll.u32 %s239_s11, 4  ;;  %s17_s10 = int_to_ptr.vmem [resolvable:$true] %s16_s10  ;;  %s261_s12 = int_to_ptr.vmem [resolvable:$true] %s25_s12 }
   0x4   :  { %s166_s15 = scalar_lea.hbm %s304_s0, 128 }
   0x5   :  { %p167_p0 = scmp.ne.s32.totalorder %s304_s0, %s166_s15  ;;  %p170_p1 = scmp.lt.u32.totalorder %s166_s15, %s304_s0 }
   0x7   :  { %p172_p2 = pnand %p170_p1, %p167_p0 }
   0x9   :  { %175 = shalt.err (!%p172_p2)
}
   0xa   :  { %s176_s20 = scalar_lea.vmem %s17_s10, 128  ;;  %p181_p4 = scmp.lt.s32.totalorder %s17_s10, %s17_s10 }
   0xb   :  { %p177_p3 = scmp.ne.s32.totalorder %s17_s10, %s176_s20  ;;  %p182_p5 = scmp.lt.s32.totalorder %s176_s20, %s176_s20 }
   0xd   :  { %p183_p6 = por %p182_p5, %p181_p4 }
   0xf   :  { %p184_p7 = pnand %p183_p6, %p177_p3 }
  0x11   :  { %187 = shalt.err (!%p184_p7)
}
  0x12   :  { %19 = dma.hbm_to_vmem [thread:$0]  %s304_s0, 128, %s17_s10, [#allocation3]  }
  0x13   :  { %s188_s25 = scalar_lea.hbm %s305_s1, 512 }
  0x14   :  { %p189_p8 = scmp.ne.s32.totalorder %s305_s1, %s188_s25  ;;  %p192_p9 = scmp.lt.u32.totalorder %s188_s25, %s305_s1 }
  0x16   :  { %p194_p10 = pnand %p192_p9, %p189_p8 }
  0x18   :  { %197 = shalt.err (!%p194_p10)
}
  0x19   :  { %s198_s30 = scalar_lea.vmem %s261_s12, 512  ;;  %p203_p12 = scmp.lt.s32.totalorder %s261_s12, %s261_s12 }
  0x1a   :  { %p199_p11 = scmp.ne.s32.totalorder %s261_s12, %s198_s30  ;;  %p204_p13 = scmp.lt.s32.totalorder %s198_s30, %s198_s30 }
  0x1c   :  { %p205_p0 = por %p204_p13, %p203_p12 }
  0x1e   :  { %p206_p1 = pnand %p205_p0, %p199_p11 }
  0x20   :  { %209 = shalt.err (!%p206_p1)
}
  0x21   :  { %s240_s0 = smov 128   ;;  %s241_s3 = smov 8  }
  0x22   :  { %31 = dma.hbm_to_vmem [thread:$0]  %s305_s1, 512, %s261_s12, [#allocation6], %s240_s0, %s240_s0, %s241_s3  }
  0x23   :  { %232 = dma.done.wait [#allocation3], 128  }
  0x24   :  { %233 = vsyncadd [#allocation3], 4294967168 }
  0x25   :  { %234 = dma.done.wait [#allocation6], 512  }
  0x26   :  { %235 = vsyncadd [#allocation6], 4294966784  ;;  %v242_v0 = vmov 0.0|0.0   ;;  %vm243_vm0 = vmmov 0   ;;  %v244_v1 = vmov 0.0   ;;  %v39_v2 = vld [vmem:[#allocation5] sm:$0xff] }
  0x27   :  { %152 = vmatprep.subr.bf16.mxu0 %v242_v0  ;;  %149 = vmatprep.mubr.msk.f32.mxu0 %vm243_vm0, %v244_v1  ;;  %v40_v3 = vld [vmem:[#allocation5 + $0x8] sm:$0xff]  ;;  %v41_v4 = vld [vmem:[#allocation5 + $0x10] sm:$0xff]  ;;  %v42_v6 = vld [vmem:[#allocation5 + $0x18] sm:$0xff]  ;;  %vm43_vm1 = vcmask 261120   ;;  %s245_s1 = smov [#allocation7]  }
  0x28   :  { %v153_v5 = vpack.c.bf16 %v40_v3, %v39_v2  ;;  %v156_v7 = vpack.c.bf16 %v42_v6, %v41_v4  ;;  %v38_v8 = vld [vmem:[#allocation2] sm:$0xff]  ;;  %s125_s6 = sshll.u32 %s245_s1, 4  ;;  %s126_s6 = int_to_ptr.vmem [resolvable:$true] %s125_s6 }
  0x29   :  { %s210_s7 = scalar_lea.vmem %s126_s6, 128  ;;  %p215_p3 = scmp.lt.s32.totalorder %s126_s6, %s126_s6 }
  0x2a   :  { %154 = vmatpush3.bf16.msra.mxu0 %v153_v5  ;;  %p211_p2 = scmp.ne.s32.totalorder %s126_s6, %s210_s7  ;;  %p216_p4 = scmp.lt.s32.totalorder %s210_s7, %s210_s7 }
  0x2b   :  { %155 = vmatprep.subr.bf16.mxu0 %v242_v0 }
  0x2c   :  { %p217_p5 = por %p216_p4, %p215_p3 }
  0x2e   :  { %157 = vmatpush3.bf16.msra.mxu0 %v156_v7  ;;  %p218_p6 = pnand %p217_p5, %p211_p2 }
  0x31   :  { %150 = vmatmul.mubr.msk.f32.vlgmr.msra.gmra.mrb[0].mxu0 %vm43_vm1, %v38_v8 }
 0x104   :  { %v113_v9 = vpop.f32.mrb[0].mxu0 }
 0x105   :  { %v117_v10 = vmax.f32 %v113_v9, 0.0  ;;  %v151_v11 = vpop.f32.mrb[1].mxu0 }
 0x107   :  { %118 = vst [vmem:[#allocation7] sm:$0xff] %v117_v10 }
 0x108   :  { %221 = shalt.err (!%p218_p6)
}
 0x109   :  { %s222_s10 = scalar_lea.hbm %s306_s2, 128 }
 0x10a   :  { %p223_p7 = scmp.ne.s32.totalorder %s306_s2, %s222_s10  ;;  %p226_p8 = scmp.lt.u32.totalorder %s222_s10, %s306_s2 }
 0x10c   :  { %p228_p9 = pnand %p226_p8, %p223_p7 }
 0x10e   :  { %231 = shalt.err (!%p228_p9)
}
 0x10f   :  { %128 = dma.vmem_to_hbm [thread:$0]  %s126_s6, 128, %s306_s2, [#allocation4]  }
 0x110   :  { %236 = dma.done.wait [#allocation4], 128  }
 0x111   :  { %237 = vsyncadd [#allocation4], 4294967168 }
 0x112   :  { %132 = vsyncpa [#allocation3], 1 }
 0x113   :  { %133 = vsyncpa [#allocation6], 1 }
 0x114   :  { %134 = vsyncpa [#allocation4], 1 }

</bundles_post_ra>
